<compile_context>
chip_gen: v6e
topology: v6e:2x2x1
jax: 0.10.0
libtpu: 0.0.40
codegen_flags: <defaults>
</compile_context>

<pallas_src>
import numpy as np
import jax
import jax.numpy as jnp
from jax.experimental import pallas as pl
from jax.experimental.pallas import tpu as pltpu

BN_EPS = 1e-5


# ----------------------- one-shot SGConv precompute kernel -------------------
def sgconv_kernel(adj_ref, node_ref, sgw_ref, sgb_ref, sg_ref):
    # SGConv (K=1): x' = A_norm @ x ; y = x' @ W^T + b   (W pre-transposed)
    prop = jnp.dot(adj_ref[...], node_ref[...], preferred_element_type=jnp.float32)
    sg_ref[...] = (jnp.dot(prop, sgw_ref[...], preferred_element_type=jnp.float32)
                   + sgb_ref[...])


def precompute_pert_table(params, adj_norm):
    """Compute the cached (num_perts+1, hidden) pert_global_emb table once."""
    P, H = params["node_emb"].shape
    vmem = pl.BlockSpec(memory_space=pltpu.MemorySpace.VMEM)
    sg = pl.pallas_call(
        sgconv_kernel,
        out_shape=jax.ShapeDtypeStruct((P, H), jnp.float32),
        in_specs=[vmem] * 4,
        out_specs=vmem,
    )(adj_norm, params["node_emb"], params["sg_wT"], params["sg_b"])
    # Row 0 = ctrl embedding (pert_emb.weight[0:1]); concat done once, result cached.
    return jnp.concatenate([params["ctrl_emb"], sg], axis=0)


# ----------------------- per-batch fused scatter + MLP kernel ----------------
def fuse_kernel(s_ref, table_ref, w1_ref, b1_ref, w2_ref, b2_ref, out_ref):
    # scatter-sum of selected table rows == S @ table  (single MXU dot)
    emb = jnp.dot(s_ref[...], table_ref[...], preferred_element_type=jnp.float32)
    # Linear (+ folded BN1) -> ReLU
    h = jnp.dot(emb, w1_ref[...], preferred_element_type=jnp.float32) + b1_ref[...]
    h = jnp.maximum(h, 0.0)
    # Linear (+ folded BN2)
    out_ref[...] = (jnp.dot(h, w2_ref[...], preferred_element_type=jnp.float32)
                    + b2_ref[...])


def gears_conditioner_pallas(folded, table, S):
    """Per-batch forward: only S varies; the table is the cached precompute result."""
    B = S.shape[0]
    out_dim = folded["b2f"].shape[-1]
    vmem = pl.BlockSpec(memory_space=pltpu.MemorySpace.VMEM)
    return pl.pallas_call(
        fuse_kernel,
        out_shape=jax.ShapeDtypeStruct((B, out_dim), jnp.float32),
        in_specs=[vmem] * 6,
        out_specs=vmem,
    )(S, table, folded["w1Tf"], folded["b1f"], folded["w2Tf"], folded["b2f"])


# ------------------------------- JAX glue ------------------------------------
def build_pert_index_matrix(pert_idx, num_perts):
    """Reproduce the host-side pert_index loop as a (B, num_perts+1) scatter matrix."""
    pert_idx = np.asarray(pert_idx)
    B = pert_idx.shape[0]
    S = np.zeros((B, num_perts + 1), dtype=np.float32)
    for idx, row in enumerate(pert_idx.tolist()):
        if all(j == -1 for j in row):
            S[idx, 0] += 1.0
        else:
            for j in row:
                if j != -1:
                    S[idx, j + 1] += 1.0
    return jnp.asarray(S)


def build_norm_adj(edge_index, edge_weight, num_nodes):
    """PyG gcn_norm: add self-loops (weight 1), D^-1/2 (A+I) D^-1/2, dense A[dst, src]."""
    row, col = edge_index[0], edge_index[1]
    loop = jnp.arange(num_nodes, dtype=row.dtype)
    row = jnp.concatenate([row, loop])
    col = jnp.concatenate([col, loop])
    w = jnp.concatenate([edge_weight, jnp.ones((num_nodes,), edge_weight.dtype)])
    deg = jnp.zeros((num_nodes,), jnp.float32).at[col].add(w)
    dinv = jnp.where(deg > 0, 1.0 / jnp.sqrt(deg), 0.0)
    norm = dinv[row] * w * dinv[col]
    adj = jnp.zeros((num_nodes, num_nodes), jnp.float32).at[col, row].add(norm)
    return adj


def init_params(key, num_perts, hidden, out_dim):
    ks = jax.random.split(key, 8)
    scale = 0.1
    emb = scale * jax.random.normal(ks[0], (num_perts + 1, hidden), jnp.float32)
    sg_w = scale * jax.random.normal(ks[1], (hidden, hidden), jnp.float32)   # torch (out,in)
    sg_b = scale * jax.random.normal(ks[2], (1, hidden), jnp.float32)
    w1 = scale * jax.random.normal(ks[3], (hidden, hidden), jnp.float32)
    b1 = scale * jax.random.normal(ks[4], (1, hidden), jnp.float32)
    w2 = scale * jax.random.normal(ks[5], (out_dim, hidden), jnp.float32)
    b2 = scale * jax.random.normal(ks[6], (1, out_dim), jnp.float32)
    kbn = jax.random.split(ks[7], 4)
    bn1 = jnp.stack([
        1.0 + 0.05 * jax.random.normal(kbn[0], (hidden,)),          # gamma
        0.05 * jax.random.normal(kbn[1], (hidden,)),                # beta
        0.02 * jax.random.normal(kbn[2], (hidden,)),                # running_mean
        1.0 + 0.1 * jnp.abs(jax.random.normal(kbn[3], (hidden,))),  # running_var
    ]).astype(jnp.float32)
    kbn2 = jax.random.split(kbn[3], 4)
    bn2 = jnp.stack([
        1.0 + 0.05 * jax.random.normal(kbn2[0], (out_dim,)),
        0.05 * jax.random.normal(kbn2[1], (out_dim,)),
        0.02 * jax.random.normal(kbn2[2], (out_dim,)),
        1.0 + 0.1 * jnp.abs(jax.random.normal(kbn2[3], (out_dim,))),
    ]).astype(jnp.float32)
    return {
        "node_emb": emb[1:], "ctrl_emb": emb[0:1],
        "sg_wT": sg_w.T, "sg_b": sg_b,
        "w1T": w1.T, "b1": b1, "bn1": bn1,
        "w2T": w2.T, "b2": b2, "bn2": bn2,
    }


def _fold_bn(wT, b, bn, eps=BN_EPS):
    """Fold inference BatchNorm into the preceding Linear (y = x@wT + b)."""
    gamma, beta, mean, var = bn[0], bn[1], bn[2], bn[3]
    s = gamma * jax.lax.rsqrt(var + eps)            # per-output-channel scale
    return wT * s[None, :], (b - mean[None, :]) * s[None, :] + beta[None, :]


def fold_mlp_params(params):
    w1Tf, b1f = _fold_bn(params["w1T"], params["b1"], params["bn1"])
    w2Tf, b2f = _fold_bn(params["w2T"], params["b2"], params["bn2"])
    return {"w1Tf": w1Tf, "b1f": b1f, "w2Tf": w2Tf, "b2f": b2f}


def reference_forward(params, S, adj_norm):
    """Unfused, unfolded reference (explicit BN) to validate hoisting + folding."""
    sg = adj_norm @ params["node_emb"] @ params["sg_wT"] + params["sg_b"]
    table = jnp.concatenate([params["ctrl_emb"], sg], axis=0)
    emb = S @ table
    h = emb @ params["w1T"] + params["b1"]
    bn1 = params["bn1"]
    h = (h - bn1[2]) / jnp.sqrt(bn1[3] + BN_EPS) * bn1[0] + bn1[1]
    h = jnp.maximum(h, 0.0)
    h = h @ params["w2T"] + params["b2"]
    bn2 = params["bn2"]
    return (h - bn2[2]) / jnp.sqrt(bn2[3] + BN_EPS) * bn2[0] + bn2[1]


if __name__ == "__main__":
    num_perts, hidden, out_dim = 24, 32, 16
    B, max_perts, n_edges = 4, 2, 40

    key = jax.random.PRNGKey(0)
    k_param, k_edge, k_w = jax.random.split(key, 3)
    params = init_params(k_param, num_perts, hidden, out_dim)
    folded = fold_mlp_params(params)

    # synthetic GO similarity graph over the num_perts perturbation nodes
    edge_index = jax.random.randint(k_edge, (2, n_edges), 0, num_perts, dtype=jnp.int32)
    edge_weight = jax.random.uniform(k_w, (n_edges,), jnp.float32, 0.1, 1.0)
    adj_norm = build_norm_adj(edge_index, edge_weight, num_perts)

    # One-shot precompute of the pert_global_emb table (cached across forward calls,
    # matching the module's enable_inference_cache / _cached_emb behaviour).
    table = precompute_pert_table(params, adj_norm)
    table = jax.block_until_ready(table)

    # batch of perturbation index lists, -1 padded (row 0 = control sample)
    pert_idx = jnp.array([[-1, -1], [3, -1], [5, 10], [7, 7]], dtype=jnp.int32)
    S = build_pert_index_matrix(pert_idx, num_perts)

    out = gears_conditioner_pallas(folded, table, S)
    out = jax.block_until_ready(out)

    ref = reference_forward(params, S, adj_norm)
    np.testing.assert_allclose(np.asarray(out), np.asarray(ref), rtol=5e-3, atol=5e-3)

    # TODO(synk): training-mode BatchNorm (batch statistics) and the nn.Embedding
    # max_norm in-place renormalization are not modeled; inference semantics used.
    print("KERNEL_OK")
</pallas_src>

<mosaic_0001>
module attributes {stable_mosaic.version = 11 : i64} {
  func.func @sgconv_kernel(%arg0: memref<24x24xf32, #tpu.memory_space<vmem>>, %arg1: memref<24x32xf32, #tpu.memory_space<vmem>>, %arg2: memref<32x32xf32, #tpu.memory_space<vmem>>, %arg3: memref<1x32xf32, #tpu.memory_space<vmem>>, %arg4: memref<24x32xf32, #tpu.memory_space<vmem>>) attributes {dimension_semantics = [], scalar_prefetch = 0 : i64, scratch_operands = 0 : i64, tpu.core_type = #tpu.core_type<tc>} {
    %c0 = arith.constant 0 : index
    %c0_0 = arith.constant 0 : index
    %0 = vector.load %arg0[%c0, %c0_0] : memref<24x24xf32, #tpu.memory_space<vmem>>, vector<24x24xf32>
    %c0_1 = arith.constant 0 : index
    %c0_2 = arith.constant 0 : index
    %1 = vector.load %arg1[%c0_1, %c0_2] : memref<24x32xf32, #tpu.memory_space<vmem>>, vector<24x32xf32>
    %cst = arith.constant dense<0.000000e+00> : vector<24x32xf32>
    %2 = tpu.matmul %0, %1, %cst {dimension_numbers = #tpu.dot_dimension_numbers<[1], [0], [0], [1], [0, 0, 1, 1], [], []>} : vector<24x24xf32>, vector<24x32xf32>, vector<24x32xf32> -> vector<24x32xf32>
    %c0_3 = arith.constant 0 : index
    %c0_4 = arith.constant 0 : index
    %3 = vector.load %arg2[%c0_3, %c0_4] : memref<32x32xf32, #tpu.memory_space<vmem>>, vector<32x32xf32>
    %cst_5 = arith.constant dense<0.000000e+00> : vector<24x32xf32>
    %4 = tpu.matmul %2, %3, %cst_5 {dimension_numbers = #tpu.dot_dimension_numbers<[1], [0], [0], [1], [0, 0, 1, 1], [], []>} : vector<24x32xf32>, vector<32x32xf32>, vector<24x32xf32> -> vector<24x32xf32>
    %c0_6 = arith.constant 0 : index
    %c0_7 = arith.constant 0 : index
    %5 = vector.load %arg3[%c0_6, %c0_7] : memref<1x32xf32, #tpu.memory_space<vmem>>, vector<1x32xf32>
    %6 = vector.broadcast %5 : vector<1x32xf32> to vector<24x32xf32>
    %7 = arith.addf %4, %6 : vector<24x32xf32>
    %c0_8 = arith.constant 0 : index
    %c0_9 = arith.constant 0 : index
    %8 = vector.load %arg4[%c0_8, %c0_9] : memref<24x32xf32, #tpu.memory_space<vmem>>, vector<24x32xf32>
    tpu.vector_store %arg4[%c0_8, %c0_9], %7 {strides = array<i32>} : memref<24x32xf32, #tpu.memory_space<vmem>>, vector<24x32xf32>,
    return
  }
}

</mosaic_0001>

<bundles_post_ra>
// kernel: tpu_custom_call.1
= control target key start
LH: loop header
LB: loop body
LE: loop exit
PB: predicated region body
PF: predicated region fallthrough
CT: control target
= control target key end

     0   :  { %9 = vsyncpa [#allocation3], 0  ;;  %s498_s0 = inlined_call_operand.hbm [shape: f32[24,24], index: 0, kind: input, shape index: {}]   ;;  %s499_s1 = inlined_call_operand.hbm [shape: f32[24,32], index: 1, kind: input, shape index: {}]   ;;  %s500_s2 = inlined_call_operand.hbm [shape: f32[32,32], index: 2, kind: input, shape index: {}]   ;;  %s501_s3 = inlined_call_operand.vmem [shape: f32[1,32], index: 3, kind: input, shape index: {}]   ;;  %s502_s4 = inlined_call_operand.hbm [shape: f32[24,32], index: 4, kind: output, shape index: {}]  }
   0x1   :  { %10 = vsyncpa [#allocation6], 0 }
   0x2   :  { %11 = vsyncpa [#allocation4], 0  ;;  %s423_s15 = smov [#allocation5]   ;;  %s424_s17 = smov [#allocation2]  }
   0x3   :  { %s29_s16 = sshll.u32 %s423_s15, 4  ;;  %s17_s18 = sshll.u32 %s424_s17, 4  ;;  %s30_s16 = int_to_ptr.vmem [resolvable:$true] %s29_s16  ;;  %s18_s18 = int_to_ptr.vmem [resolvable:$true] %s17_s18 }
   0x4   :  { %s345_s19 = scalar_lea.vmem %s30_s16, 384  ;;  %p350_p1 = scmp.lt.s32.totalorder %s30_s16, %s30_s16 }
   0x5   :  { %p346_p0 = scmp.ne.s32.totalorder %s30_s16, %s345_s19  ;;  %p351_p2 = scmp.lt.s32.totalorder %s345_s19, %s345_s19 }
   0x7   :  { %p352_p3 = por %p351_p2, %p350_p1 }
   0x9   :  { %p353_p4 = pnand %p352_p3, %p346_p0 }
   0xb   :  { %356 = shalt.err (!%p353_p4)
}
   0xc   :  { %s425_s20 = smov 128   ;;  %s426_s21 = smov 8  }
   0xd   :  { %35 = dma.hbm_to_vmem [thread:$0]  %s499_s1, 384, %s30_s16, [#allocation6], %s425_s20, %s425_s20, %s426_s21  }
   0xe   :  { %s365_s24 = scalar_lea.vmem %s18_s18, 384  ;;  %p370_p6 = scmp.lt.s32.totalorder %s18_s18, %s18_s18 }
   0xf   :  { %p366_p5 = scmp.ne.s32.totalorder %s18_s18, %s365_s24  ;;  %p371_p7 = scmp.lt.s32.totalorder %s365_s24, %s365_s24 }
  0x11   :  { %p372_p8 = por %p371_p7, %p370_p6 }
  0x13   :  { %p373_p9 = pnand %p372_p8, %p366_p5 }
  0x15   :  { %376 = shalt.err (!%p373_p9)
}
  0x16   :  { %23 = dma.hbm_to_vmem [thread:$0]  %s498_s0, 384, %s18_s18, [#allocation3], %s425_s20, %s425_s20, %s426_s21  }
  0x17   :  { %s427_s27 = smov [#allocation7]  }
  0x18   :  { %s41_s28 = sshll.u32 %s427_s27, 4  ;;  %s42_s28 = int_to_ptr.vmem [resolvable:$true] %s41_s28 }
  0x19   :  { %s385_s29 = scalar_lea.vmem %s42_s28, 512  ;;  %p390_p11 = scmp.lt.s32.totalorder %s42_s28, %s42_s28 }
  0x1a   :  { %p386_p10 = scmp.ne.s32.totalorder %s42_s28, %s385_s29  ;;  %p391_p12 = scmp.lt.s32.totalorder %s385_s29, %s385_s29 }
  0x1c   :  { %p392_p13 = por %p391_p12, %p390_p11 }
  0x1e   :  { %p393_p0 = pnand %p392_p13, %p386_p10 }
  0x20   :  { %396 = shalt.err (!%p393_p0)
}
  0x21   :  { %47 = dma.hbm_to_vmem [thread:$0]  %s500_s2, 512, %s42_s28, [#allocation6], %s425_s20, %s425_s20, %s426_s21  }
  0x22   :  { %417 = dma.done.wait [#allocation3], 384  }
  0x23   :  { %418 = vsyncadd [#allocation3], 4294966912 }
  0x24   :  { %419 = dma.done.wait [#allocation6], 896  }
  0x25   :  { %420 = vsyncadd [#allocation6], 4294966400  ;;  %v428_v0 = vmov 0.0   ;;  %vm429_vm0 = vmmov 0   ;;  %v64_v1 = vld [vmem:[#allocation5 + $0x10] sm:$0xff]  ;;  %v63_v2 = vld [vmem:[#allocation5 + $0x8] sm:$0xff] }
  0x26   :  { %297 = vmatprep.subr.mxu0 %v428_v0  ;;  %303 = vmatprep.mubr.msk.f32.mxu0 %vm429_vm0, %v428_v0  ;;  %v62_v3 = vld [vmem:[#allocation5] sm:$0xff]  ;;  %v158_v4 = vld [vmem:[#allocation7 + $0x18] sm:$0xff]  ;;  %v157_v5 = vld [vmem:[#allocation7 + $0x10] sm:$0xff]  ;;  %vm65_vm1 = vcmask 195584   ;;  %vm166_vm2 = vcmask 261120   ;;  %s430_s5 = smov [#allocation8]  }
  0x27   :  { %312 = vmatprep.subr.mxu1 %v428_v0  ;;  %320 = vmatprep.mubr.msk.f32.mxu1 %vm429_vm0, %v428_v0  ;;  %v59_v6 = vld [vmem:[#allocation2] sm:$0xff]  ;;  %v156_v7 = vld [vmem:[#allocation7 + $0x8] sm:$0xff]  ;;  %v60_v8 = vld [vmem:[#allocation2 + $0x8] sm:$0xff]  ;;  %s264_s6 = sshll.u32 %s430_s5, 4  ;;  %s265_s6 = int_to_ptr.vmem [resolvable:$true] %s264_s6 }
  0x28   :  { %298 = vmatpush3.msra.mxu0 %v64_v1  ;;  %313 = vmatpush3.msra.mxu1 %v158_v4  ;;  %v61_v9 = vld [vmem:[#allocation2 + $0x10] sm:$0xff]  ;;  %v280_v17 = vld [vmem:[%s501_s3] ss:$0 sm:$0xff]  ;;  %s397_s7 = scalar_lea.vmem %s265_s6, 384  ;;  %p402_p2 = scmp.lt.s32.totalorder %s265_s6, %s265_s6 }
  0x29   :  { %299 = vmatprep.subr.mxu0 %v428_v0  ;;  %314 = vmatprep.subr.mxu1 %v428_v0  ;;  %v155_v10 = vld [vmem:[#allocation7] sm:$0xff]  ;;  %p398_p1 = scmp.ne.s32.totalorder %s265_s6, %s397_s7  ;;  %p403_p3 = scmp.lt.s32.totalorder %s397_s7, %s397_s7 }
  0x2a   :  { %300 = vmatpush3.msra.mxu0 %v63_v2  ;;  %315 = vmatpush3.msra.mxu1 %v157_v5 }
  0x2b   :  { %301 = vmatprep.subr.mxu0 %v428_v0  ;;  %316 = vmatprep.subr.mxu1 %v428_v0  ;;  %p404_p4 = por %p403_p3, %p402_p2 }
  0x2c   :  { %302 = vmatpush3.msra.mxu0 %v62_v3  ;;  %317 = vmatpush3.msra.mxu1 %v156_v7 }
  0x2d   :  { %304 = vmatmul.mubr.msk.f32.vlgmr.msra.gmra.mxu0 %vm65_vm1, %v59_v6  ;;  %318 = vmatprep.subr.mxu1 %v428_v0  ;;  %p405_p5 = pnand %p404_p4, %p398_p1 }
  0x2e   :  { %306 = vmatprep.mubr.msk.f32.mxu0 %vm429_vm0, %v428_v0  ;;  %319 = vmatpush3.msra.mxu1 %v155_v10 }
  0x31   :  { %307 = vmatmul.mubr.msk.f32.gmra.mxu0 %vm65_vm1, %v60_v8 }
  0x32   :  { %309 = vmatprep.mubr.msk.f32.mxu0 %vm429_vm0, %v428_v0 }
  0x35   :  { %310 = vmatmul.mubr.msk.f32.gmra.mxu0 %vm65_vm1, %v61_v9 }
  0xed   :  { %v141_v11 = vpop.f32.mrf.mxu0 }
  0xee   :  { %321 = vmatmul.mubr.msk.f32.vlgmr.msra.gmra.mxu1 %vm166_vm2, %v141_v11 }
  0xef   :  { %v305_v12 = vpop.f32.mrf.mxu0  ;;  %323 = vmatprep.mubr.msk.f32.mxu1 %vm429_vm0, %v428_v0 }
  0xf1   :  { %v146_v13 = vpop.f32.mrf.mxu0 }
  0xf2   :  { %324 = vmatmul.mubr.msk.f32.gmra.mxu1 %vm166_vm2, %v146_v13 }
  0xf3   :  { %v308_v14 = vpop.f32.mrf.mxu0  ;;  %326 = vmatprep.mubr.msk.f32.mxu1 %vm429_vm0, %v428_v0 }
  0xf5   :  { %v151_v15 = vpop.f32.mrf.mxu0 }
  0xf6   :  { %327 = vmatmul.mubr.msk.f32.gmra.mxu1 %vm166_vm2, %v151_v15 }
  0xf7   :  { %v311_v16 = vpop.f32.mrf.mxu0 }
 0x1ae   :  { %v242_v18 = vpop.f32.mrf.mxu1 }
 0x1af   :  { %v243_v19 = vadd.f32 %v280_v17, %v242_v18 }
 0x1b0   :  { %v322_v20 = vpop.f32.mrf.mxu1 }
 0x1b1   :  { %256 = vst.msk [vmem:[#allocation8] sm:$0xff] %vm166_vm2, %v243_v19 }
 0x1b2   :  { %v247_v21 = vpop.f32.mrf.mxu1 }
 0x1b3   :  { %v248_v22 = vadd.f32 %v280_v17, %v247_v21 }
 0x1b4   :  { %v325_v23 = vpop.f32.mrf.mxu1 }
 0x1b5   :  { %257 = vst.msk [vmem:[#allocation8 + $0x8] sm:$0xff] %vm166_vm2, %v248_v22 }
 0x1b6   :  { %v252_v24 = vpop.f32.mrf.mxu1 }
 0x1b7   :  { %v253_v25 = vadd.f32 %v280_v17, %v252_v24 }
 0x1b8   :  { %v328_v26 = vpop.f32.mrf.mxu1 }
 0x1b9   :  { %258 = vst.msk [vmem:[#allocation8 + $0x10] sm:$0xff] %vm166_vm2, %v253_v25 }
 0x1ba   :  { %408 = shalt.err (!%p405_p5)
}
 0x1bb   :  { %270 = dma.vmem_to_hbm [thread:$0]  %s265_s6, 384, %s502_s4, [#allocation4], %s425_s20, %s425_s20, %s426_s21  }
 0x1bc   :  { %421 = dma.done.wait [#allocation4], 384  }
 0x1bd   :  { %422 = vsyncadd [#allocation4], 4294966912 }
 0x1be   :  { %274 = vsyncpa [#allocation3], 1 }
 0x1bf   :  { %275 = vsyncpa [#allocation6], 1 }
 0x1c0   :  { %276 = vsyncpa [#allocation4], 1 }

</bundles_post_ra>
